<compile_context>
chip_gen: v5e
topology: v5e:2x2
jax: 0.10.0
libtpu: 0.0.40
codegen_flags: <defaults>
</compile_context>

<pallas_src>
import functools

import jax
import jax.numpy as jnp
from jax import lax
from jax.experimental import pallas as pl
from jax.experimental.pallas import tpu as pltpu

EPS = 1e-5                       # torch.nn.BatchNorm1d default eps
LANE = 128
MAX_TILE_N = 64 * 1024           # batch lanes per grid step (256 KiB of x/step)
VMEM_LIMIT = 32 * 1024 * 1024    # safe scoped-VMEM budget on v5e/v6e/v7x


def _fold_bn(sx, sxx, w1, b1, gamma, beta, n_valid):
    """Fold Linear1 + training-mode BatchNorm into per-feature scale/shift.

    bn(w1*x + b1) == a1 * x + c1  with  a1 = scale*w1,
    c1 = scale*(b1 - mean_h) + beta,  scale = gamma*rsqrt(var_h + eps).
    sx/sxx are (1,1); per-feature params are (H,1).
    """
    inv_n = 1.0 / n_valid
    mean_x = sx * inv_n
    # E[x^2] - mean^2 can cancel slightly negative in f32 -> clamp (avoids NaN).
    var_x = jnp.maximum(sxx * inv_n - mean_x * mean_x, 0.0)
    mean_h = w1 * mean_x + b1               # (H, 1)
    var_h = (w1 * w1) * var_x               # (H, 1), biased (train-mode) var
    scale = gamma * lax.rsqrt(var_h + EPS)
    a1 = scale * w1
    c1 = scale * (b1 - mean_h) + beta
    return a1, c1


def fused_mlp_kernel(x_ref, w1_ref, b1_ref, gamma_ref, beta_ref,
                     w2_ref, b2_ref, o_ref, *, n_valid):
    """Single-block path: whole batch resident, x read from HBM exactly once."""
    x = x_ref[...]                                      # (1, N) block == array
    sx = jnp.sum(x, keepdims=True)                      # (1, 1)
    sxx = jnp.sum(x * x, keepdims=True)                 # (1, 1)
    a1, c1 = _fold_bn(sx, sxx, w1_ref[...], b1_ref[...],
                      gamma_ref[...], beta_ref[...], n_valid)
    h = jnp.maximum(a1 * x + c1, 0.0)                   # (H, N) VPU outer prod
    # Linear2 (H -> 1) on the MXU: w2 zero-padded to 8 rows, keep row 0.
    res = jnp.dot(w2_ref[...], h, preferred_element_type=jnp.float32)   # (8, N)
    o_ref[...] = res[0:1, :] + b2_ref[...]


def bn_stats_kernel(x_ref, w1_ref, b1_ref, gamma_ref, beta_ref,
                    a1_ref, c1_ref, sx_ref, sxx_ref,
                    *, n_valid, tile_n, ragged):
    """Pass 1: stream x, accumulate Sx / Sxx, finalize per-feature (a1, c1)."""
    t = pl.program_id(0)
    last = pl.num_programs(0) - 1

    @pl.when(t == 0)
    def _init():
        sx_ref[...] = jnp.zeros_like(sx_ref)
        sxx_ref[...] = jnp.zeros_like(sxx_ref)

    x = x_ref[...]                                      # (1, tile_n)

    def _accumulate(xv):
        sx_ref[...] += jnp.sum(xv, keepdims=True)
        sxx_ref[...] += jnp.sum(xv * xv, keepdims=True)

    if ragged:
        # Only the final (ragged) tile pays for masking its garbage lanes.
        @pl.when(t != last)
        def _full_tile():
            _accumulate(x)

        @pl.when(t == last)
        def _ragged_tile():
            col = lax.broadcasted_iota(jnp.int32, (1, tile_n), 1)
            valid = col < (n_valid - t * tile_n)
            _accumulate(jnp.where(valid, x, 0.0))       # select, not multiply
    else:
        _accumulate(x)

    @pl.when(t == last)
    def _finalize():
        a1, c1 = _fold_bn(sx_ref[...], sxx_ref[...], w1_ref[...], b1_ref[...],
                          gamma_ref[...], beta_ref[...], n_valid)
        a1_ref[...] = a1
        c1_ref[...] = c1


def mlp_apply_kernel(x_ref, a1_ref, c1_ref, w2_ref, b2_ref, o_ref):
    """Pass 2: fused (Linear1+BN) -> ReLU -> Linear2, lane-dense output."""
    x = x_ref[...]                                      # (1, tile_n)
    h = jnp.maximum(a1_ref[...] * x + c1_ref[...], 0.0)                # (H, tile_n)
    res = jnp.dot(w2_ref[...], h, preferred_element_type=jnp.float32)  # (8, tile_n)
    # Garbage columns of a ragged final block only hit OOB output lanes,
    # which are dropped on writeback.
    o_ref[...] = res[0:1, :] + b2_ref[...]


def mlp_forward(x, w1, b1, gamma, beta, w2, b2, *, max_tile_n=MAX_TILE_N):
    """Linear(1,H) -> BatchNorm1d(H, training) -> ReLU -> Linear(H,1).

    x:  (N, 1) (PyTorch layout)        w1: (H, 1)   b1/gamma/beta: (H,)
    w2: (1, H)                         b2: (1,)
    returns (N, 1) f32.
    """
    n, num_inp = x.shape
    assert num_inp == 1, "kernel is specialized to the default MLP(num_inp=1)"
    assert n > 0, "empty batch: BatchNorm statistics undefined"
    h_dim = w1.shape[0]

    # Lane-dense layout: batch on the 128-wide lane axis. No padded copy —
    # reshape only; ragged final blocks are handled in-kernel / by writeback.
    x_row = x.reshape(1, n).astype(jnp.float32)

    w1c = w1.reshape(h_dim, 1).astype(jnp.float32)
    b1c = b1.reshape(h_dim, 1).astype(jnp.float32)
    gc = gamma.reshape(h_dim, 1).astype(jnp.float32)
    bc = beta.reshape(h_dim, 1).astype(jnp.float32)
    # w2 as an (8, H) row-padded matrix so Linear2 can run on the MXU.
    w2r = jnp.zeros((8, h_dim), jnp.float32).at[0, :].set(
        w2.reshape(h_dim).astype(jnp.float32))
    b2c = b2.reshape(1, 1).astype(jnp.float32)

    if n <= max_tile_n:
        # Small/medium batch: one launch, whole batch resident, x read once.
        out = pl.pallas_call(
            functools.partial(fused_mlp_kernel, n_valid=n),
            out_shape=jax.ShapeDtypeStruct((1, n), jnp.float32),
            compiler_params=pltpu.CompilerParams(vmem_limit_bytes=VMEM_LIMIT),
        )(x_row, w1c, b1c, gc, bc, w2r, b2c)
        return out.reshape(n, 1)

    # Large batch: two tiled passes (pass 2 is 'parallel' -> both TCs on v7x).
    tile_n = max(LANE, (max_tile_n // LANE) * LANE)     # multiple of 128
    num_tiles = pl.cdiv(n, tile_n)
    ragged = (n % tile_n) != 0

    x_spec = pl.BlockSpec((1, tile_n), lambda t: (0, t))
    feat_spec = pl.BlockSpec((h_dim, 1), lambda t: (0, 0))
    w2_spec = pl.BlockSpec((8, h_dim), lambda t: (0, 0))
    scl_spec = pl.BlockSpec((1, 1), lambda t: (0, 0))

    # Pass 1: Sx/Sxx accumulation (sequential) + fold into (a1, c1).
    # TODO(synk): on v7x this single 'arbitrary' chain uses one TensorCore; a
    # 2-way partial-sum split would roughly halve this (already HBM-bound) pass.
    a1, c1 = pl.pallas_call(
        functools.partial(bn_stats_kernel, n_valid=n, tile_n=tile_n,
                          ragged=ragged),
        grid=(num_tiles,),
        in_specs=[x_spec, feat_spec, feat_spec, feat_spec, feat_spec],
        out_specs=[feat_spec, feat_spec],
        out_shape=[jax.ShapeDtypeStruct((h_dim, 1), jnp.float32)] * 2,
        scratch_shapes=[pltpu.VMEM((1, 1), jnp.float32),
                        pltpu.VMEM((1, 1), jnp.float32)],
        compiler_params=pltpu.CompilerParams(
            dimension_semantics=("arbitrary",),
            vmem_limit_bytes=VMEM_LIMIT),
    )(x_row, w1c, b1c, gc, bc)

    # Pass 2: fused normalize + ReLU + Linear2; batch tiles are independent.
    out = pl.pallas_call(
        mlp_apply_kernel,
        grid=(num_tiles,),
        in_specs=[x_spec, feat_spec, feat_spec, w2_spec, scl_spec],
        out_specs=pl.BlockSpec((1, tile_n), lambda t: (0, t)),
        out_shape=jax.ShapeDtypeStruct((1, n), jnp.float32),
        compiler_params=pltpu.CompilerParams(
            dimension_semantics=("parallel",),
            vmem_limit_bytes=VMEM_LIMIT),
    )(x_row, a1, c1, w2r, b2c)

    return out.reshape(n, 1)


if __name__ == "__main__":
    key = jax.random.PRNGKey(0)
    NUM_INP, NUM_HIDDEN = 1, 16
    kx1, kx2, kw1, kb1, kw2, kb2 = jax.random.split(key, 6)

    # Deterministic params mirroring PyTorch defaults (Linear: U(+-1/sqrt(fan_in));
    # BatchNorm: gamma=1, beta=0). Weight layouts match PyTorch (out, in).
    bound1 = 1.0 / (NUM_INP ** 0.5)
    w1 = jax.random.uniform(kw1, (NUM_HIDDEN, NUM_INP), jnp.float32, -bound1, bound1)
    b1 = jax.random.uniform(kb1, (NUM_HIDDEN,), jnp.float32, -bound1, bound1)
    gamma = jnp.ones((NUM_HIDDEN,), jnp.float32)
    beta = jnp.zeros((NUM_HIDDEN,), jnp.float32)
    bound2 = 1.0 / (NUM_HIDDEN ** 0.5)
    w2 = jax.random.uniform(kw2, (1, NUM_HIDDEN), jnp.float32, -bound2, bound2)
    b2 = jax.random.uniform(kb2, (1,), jnp.float32, -bound2, bound2)

    def reference(xv):
        # Pure-JAX reference of the PyTorch forward (training-mode BatchNorm).
        h = xv @ w1.T + b1
        mean = h.mean(axis=0)
        var = ((h - mean) ** 2).mean(axis=0)
        hn = (h - mean) * lax.rsqrt(var + EPS) * gamma + beta
        return jnp.maximum(hn, 0.0) @ w2.T + b2

    # (a) Small batch -> fused single-launch path.
    x_small = jax.random.normal(kx1, (8, NUM_INP), dtype=jnp.float32)
    out_small = jax.block_until_ready(
        mlp_forward(x_small, w1, b1, gamma, beta, w2, b2))
    assert out_small.shape == (8, 1) and out_small.dtype == jnp.float32
    assert jnp.allclose(out_small, reference(x_small), rtol=1e-4, atol=1e-4), (
        out_small, reference(x_small))

    # (b) Tiled two-pass path with a ragged final block (tile cap forced small
    #     so the large-batch code path is exercised at a tiny shape).
    x_big = jax.random.normal(kx2, (300, NUM_INP), dtype=jnp.float32)
    out_big = jax.block_until_ready(
        mlp_forward(x_big, w1, b1, gamma, beta, w2, b2, max_tile_n=128))
    assert out_big.shape == (300, 1)
    assert jnp.allclose(out_big, reference(x_big), rtol=1e-4, atol=1e-4), (
        out_big, reference(x_big))

    print("KERNEL_OK")
</pallas_src>

<mosaic_0001>
module attributes {stable_mosaic.version = 11 : i64} {
  func.func @fused_mlp_kernel(%arg0: memref<1x8xf32, #tpu.memory_space<vmem>>, %arg1: memref<16x1xf32, #tpu.memory_space<vmem>>, %arg2: memref<16x1xf32, #tpu.memory_space<vmem>>, %arg3: memref<16x1xf32, #tpu.memory_space<vmem>>, %arg4: memref<16x1xf32, #tpu.memory_space<vmem>>, %arg5: memref<8x16xf32, #tpu.memory_space<vmem>>, %arg6: memref<1x1xf32, #tpu.memory_space<vmem>>, %arg7: memref<1x8xf32, #tpu.memory_space<vmem>>) attributes {dimension_semantics = [], scalar_prefetch = 0 : i64, scratch_operands = 0 : i64, tpu.core_type = #tpu.core_type<tc>} {
    %c0 = arith.constant 0 : index
    %c0_0 = arith.constant 0 : index
    %0 = vector.load %arg0[%c0, %c0_0] : memref<1x8xf32, #tpu.memory_space<vmem>>, vector<1x8xf32>
    %1 = vector.shape_cast %0 : vector<1x8xf32> to vector<1x1x8xf32>
    %cst = arith.constant dense<0.000000e+00> : vector<1xf32>
    %2 = vector.multi_reduction <add>, %1, %cst [1, 2] : vector<1x1x8xf32> to vector<1xf32>
    %3 = vector.shape_cast %2 : vector<1xf32> to vector<1x1x1xf32>
    %4 = vector.extract %3[0, 0, 0] : f32 from vector<1x1x1xf32>
    %5 = vector.broadcast %4 : f32 to vector<1x1xf32>
    %6 = arith.mulf %0, %0 : vector<1x8xf32>
    %7 = vector.shape_cast %6 : vector<1x8xf32> to vector<1x1x8xf32>
    %cst_1 = arith.constant dense<0.000000e+00> : vector<1xf32>
    %8 = vector.multi_reduction <add>, %7, %cst_1 [1, 2] : vector<1x1x8xf32> to vector<1xf32>
    %9 = vector.shape_cast %8 : vector<1xf32> to vector<1x1x1xf32>
    %10 = vector.extract %9[0, 0, 0] : f32 from vector<1x1x1xf32>
    %11 = vector.broadcast %10 : f32 to vector<1x1xf32>
    %c0_2 = arith.constant 0 : index
    %c0_3 = arith.constant 0 : index
    %12 = vector.load %arg1[%c0_2, %c0_3] : memref<16x1xf32, #tpu.memory_space<vmem>>, vector<16x1xf32>
    %c0_4 = arith.constant 0 : index
    %c0_5 = arith.constant 0 : index
    %13 = vector.load %arg2[%c0_4, %c0_5] : memref<16x1xf32, #tpu.memory_space<vmem>>, vector<16x1xf32>
    %c0_6 = arith.constant 0 : index
    %c0_7 = arith.constant 0 : index
    %14 = vector.load %arg3[%c0_6, %c0_7] : memref<16x1xf32, #tpu.memory_space<vmem>>, vector<16x1xf32>
    %c0_8 = arith.constant 0 : index
    %c0_9 = arith.constant 0 : index
    %15 = vector.load %arg4[%c0_8, %c0_9] : memref<16x1xf32, #tpu.memory_space<vmem>>, vector<16x1xf32>
    %cst_10 = arith.constant 1.250000e-01 : f32
    %16 = vector.broadcast %cst_10 : f32 to vector<1x1xf32>
    %17 = arith.mulf %5, %16 : vector<1x1xf32>
    %cst_11 = arith.constant 1.250000e-01 : f32
    %18 = vector.broadcast %cst_11 : f32 to vector<1x1xf32>
    %19 = arith.mulf %11, %18 : vector<1x1xf32>
    %20 = arith.mulf %17, %17 : vector<1x1xf32>
    %21 = arith.subf %19, %20 : vector<1x1xf32>
    %cst_12 = arith.constant 0.000000e+00 : f32
    %22 = vector.broadcast %cst_12 : f32 to vector<1x1xf32>
    %23 = arith.maximumf %21, %22 : vector<1x1xf32>
    %24 = vector.broadcast %17 : vector<1x1xf32> to vector<16x1xf32>
    %25 = arith.mulf %12, %24 : vector<16x1xf32>
    %26 = arith.addf %25, %13 : vector<16x1xf32>
    %27 = arith.mulf %12, %12 : vector<16x1xf32>
    %28 = vector.broadcast %23 : vector<1x1xf32> to vector<16x1xf32>
    %29 = arith.mulf %27, %28 : vector<16x1xf32>
    %cst_13 = arith.constant 9.99999974E-6 : f32
    %30 = vector.broadcast %cst_13 : f32 to vector<16x1xf32>
    %31 = arith.addf %29, %30 : vector<16x1xf32>
    %32 = math.rsqrt %31 : vector<16x1xf32>
    %33 = arith.mulf %14, %32 : vector<16x1xf32>
    %34 = arith.mulf %33, %12 : vector<16x1xf32>
    %35 = arith.subf %13, %26 : vector<16x1xf32>
    %36 = arith.mulf %33, %35 : vector<16x1xf32>
    %37 = arith.addf %36, %15 : vector<16x1xf32>
    %38 = vector.broadcast %34 : vector<16x1xf32> to vector<16x8xf32>
    %39 = vector.broadcast %0 : vector<1x8xf32> to vector<16x8xf32>
    %40 = arith.mulf %38, %39 : vector<16x8xf32>
    %41 = vector.broadcast %37 : vector<16x1xf32> to vector<16x8xf32>
    %42 = arith.addf %40, %41 : vector<16x8xf32>
    %cst_14 = arith.constant 0.000000e+00 : f32
    %43 = vector.broadcast %cst_14 : f32 to vector<16x8xf32>
    %44 = arith.maximumf %42, %43 : vector<16x8xf32>
    %c0_15 = arith.constant 0 : index
    %c0_16 = arith.constant 0 : index
    %45 = vector.load %arg5[%c0_15, %c0_16] : memref<8x16xf32, #tpu.memory_space<vmem>>, vector<8x16xf32>
    %cst_17 = arith.constant dense<0.000000e+00> : vector<8x8xf32>
    %46 = tpu.matmul %45, %44, %cst_17 {dimension_numbers = #tpu.dot_dimension_numbers<[1], [0], [0], [1], [0, 0, 1, 1], [], []>} : vector<8x16xf32>, vector<16x8xf32>, vector<8x8xf32> -> vector<8x8xf32>
    %47 = vector.extract_strided_slice %46 {offsets = [0, 0], sizes = [1, 8], strides = [1, 1]} : vector<8x8xf32> to vector<1x8xf32>
    %c0_18 = arith.constant 0 : index
    %c0_19 = arith.constant 0 : index
    %48 = vector.load %arg6[%c0_18, %c0_19] : memref<1x1xf32, #tpu.memory_space<vmem>>, vector<1x1xf32>
    %49 = vector.broadcast %48 : vector<1x1xf32> to vector<1x8xf32>
    %50 = arith.addf %47, %49 : vector<1x8xf32>
    %c0_20 = arith.constant 0 : index
    %c0_21 = arith.constant 0 : index
    %51 = vector.load %arg7[%c0_20, %c0_21] : memref<1x8xf32, #tpu.memory_space<vmem>>, vector<1x8xf32>
    tpu.vector_store %arg7[%c0_20, %c0_21], %50 {strides = array<i32>} : memref<1x8xf32, #tpu.memory_space<vmem>>, vector<1x8xf32>,
    return
  }
}

</mosaic_0001>

<bundles_post_ra>
// kernel: tpu_custom_call.1
= control target key start
LH: loop header
LB: loop body
LE: loop exit
PB: predicated region body
PF: predicated region fallthrough
CT: control target
= control target key end

     0   :  { %s311_s0 = inlined_call_operand.vmem [shape: f32[1,8], index: 0, kind: input, shape index: {}]   ;;  %s312_s1 = inlined_call_operand.vmem [shape: f32[16,1], index: 1, kind: input, shape index: {}]   ;;  %s313_s2 = inlined_call_operand.vmem [shape: f32[16,1], index: 2, kind: input, shape index: {}]   ;;  %s314_s3 = inlined_call_operand.vmem [shape: f32[16,1], index: 3, kind: input, shape index: {}]   ;;  %s315_s4 = inlined_call_operand.vmem [shape: f32[16,1], index: 4, kind: input, shape index: {}]   ;;  %s316_s5 = inlined_call_operand.vmem [shape: f32[8,16], index: 5, kind: input, shape index: {}]   ;;  %s317_s6 = inlined_call_operand.<no memory space> [shape: f32[1,1], index: 6, kind: input, shape index: {}]   ;;  %s318_s7 = inlined_call_operand.hbm [shape: f32[1,8], index: 7, kind: output, shape index: {}]  }
   0x1   :  { %v12_v0 = vstv %s317_s6 }
   0x2   :  { %13 = vst [vmem:[#allocation2] sm:$0x1] %v12_v0 }
   0x3   :  { %v29_v1 = vld [vmem:[%s311_s0] sm:$0x1]  ;;  %vm30_vm0 = vcmask 57344  }
   0x4   :  { %14 = vsyncpa [#allocation4], 0  ;;  %v31_v2 = vsel %vm30_vm0, %v29_v1, 0.0  ;;  %v42_v3 = vmul.f32 %v29_v1, %v29_v1  ;;  %v227_v19 = vmov 0   ;;  %v54_v25 = vld [vmem:[%s312_s1] sm:$0xff]  ;;  %v55_v26 = vld [vmem:[%s312_s1 + $0x8] sm:$0xff] }
   0x5   :  { %32 = vadd.xlane.f32.xlu0 %v31_v2  ;;  %193 = vset.pattern.permute.xlu1 %v227_v19  ;;  %v71_v28 = vmul.f32 %v54_v25, %v54_v25  ;;  %v72_v29 = vmul.f32 %v55_v26, %v55_v26  ;;  %v57_v44 = vld [vmem:[%s313_s2 + $0x8] sm:$0xff]  ;;  %v56_v52 = vld [vmem:[%s313_s2] sm:$0xff]  ;;  %vm137_vm7 = vcmask 130048   ;;  %s177_s25 = sshll.u32 %s318_s7, 4  ;;  %s178_s25 = int_to_ptr.hbm [resolvable:$true] %s177_s25 }
   0x6   :  { %v43_v4 = vsel %vm30_vm0, %v42_v3, 0.0  ;;  %194 = vset.pattern.permute.xlu2 %v227_v19  ;;  %195 = vset.pattern.permute.xlu0 %v227_v19  ;;  %v59_v48 = vld [vmem:[%s314_s3 + $0x8] sm:$0xff]  ;;  %v58_v57 = vld [vmem:[%s314_s3] sm:$0xff] }
   0x7   :  { %v61_v56 = vld [vmem:[%s315_s4 + $0x8] sm:$0xff]  ;;  %v60_v2 = vld [vmem:[%s315_s4] sm:$0xff] }
   0xd   :  { %44 = vadd.xlane.f32.xlu0 %v43_v4 }
  0x78   :  { %v33_v5 = vpop.xlane.xlu0 %32 }
  0x79   :  { %v34_v6 = vrot.slane %v33_v5, 4 }
  0x7b   :  { %v35_v7 = vadd.f32 %v34_v6, %v33_v5  ;;  %v161_v5 = vld [vmem:[#allocation2] sm:$0x1] }
  0x7c   :  { %164 = vperm.xlu0 %195, %v161_v5   ;;  %v196_v6 = vld [vmem:[%s311_s0] ss:$0 sm:$0xff]  ;;  %s228_s0 = smov [#allocation3]  }
  0x7d   :  { %v36_v8 = vrot.slane %v35_v7, 2  ;;  %s175_s22 = sshll.u32 %s228_s0, 4  ;;  %s176_s22 = int_to_ptr.vmem [resolvable:$true] %s175_s22 }
  0x7f   :  { %v37_v9 = vadd.f32 %v36_v8, %v35_v7 }
  0x80   :  { %v45_v10 = vpop.xlane.xlu0 %44 }
  0x81   :  { %v46_v11 = vrot.slane %v45_v10, 4  ;;  %v38_v12 = vrot.slane %v37_v9, 1 }
  0x83   :  { %v47_v13 = vadd.f32 %v46_v11, %v45_v10  ;;  %v39_v14 = vadd.f32 %v38_v12, %v37_v9 }
  0x85   :  { %v48_v15 = vrot.slane %v47_v13, 2  ;;  %187 = vpush %v39_v14 }
  0x87   :  { %v49_v16 = vadd.f32 %v48_v15, %v47_v13 }
  0x89   :  { %v50_v17 = vrot.slane %v49_v16, 1 }
  0x8b   :  { %v51_v18 = vadd.f32 %v50_v17, %v49_v16  ;;  %v136_v17 = vld [vmem:[%s316_s5] sm:$0xff] }
  0x8d   :  { %189 = vpush %v51_v18 }
  0xb6   :  { %s188_s6 = spop %187 }
  0xb7   :  { %v41_v20 = vstv %s188_s6 }
  0xb8   :  { %v62_v21 = vmul.f32 0.125, %v41_v20 }
  0xba   :  { %v64_v24 = vmul.f32 %v62_v21, %v62_v21  ;;  %v68_v42 = vmul.f32 %v62_v21, %v55_v26  ;;  %v67_v51 = vmul.f32 %v62_v21, %v54_v25 }
  0xbc   :  { %v70_v47 = vadd.f32 %v68_v42, %v57_v44  ;;  %v69_v59 = vadd.f32 %v67_v51, %v56_v52 }
  0xbe   :  { %s190_s28 = spop %189  ;;  %v102_v55 = vsub.f32 %v57_v44, %v70_v47  ;;  %v101_v0 = vsub.f32 %v56_v52, %v69_v59 }
  0xbf   :  { %v53_v22 = vstv %s190_s28 }
  0xc0   :  { %v63_v23 = vmul.f32 0.125, %v53_v22 }
  0xc2   :  { %v65_v27 = vsub.f32 %v63_v23, %v64_v24 }
  0xc4   :  { %v66_v30 = vmax.f32 %v65_v27, 0.0 }
  0xc6   :  { %v73_v31 = vmul.f32 %v71_v28, %v66_v30  ;;  %v74_v32 = vmul.f32 %v72_v29, %v66_v30 }
  0xc8   :  { %v75_v33 = vadd.f32 1e-05, %v73_v31  ;;  %v76_v34 = vadd.f32 1e-05, %v74_v32 }
  0xca   :  { %197 = vrsqrt.f32 %v75_v33  ;;  %vm93_vm2 = vweird.f32 %v76_v34  ;;  %vm83_vm5 = vweird.f32 %v75_v33 }
  0xcb   :  { %199 = vrsqrt.f32 %v76_v34 }
  0xd0   :  { %v198_v35 = vpop.eup %197 }
  0xd1   :  { %v200_v36 = vpop.eup %199  ;;  %v78_v37 = vmul.f32 %v198_v35, %v75_v33  ;;  %vm84_vm3 = vweird.f32 %v198_v35 }
  0xd2   :  { %v88_v38 = vmul.f32 %v200_v36, %v76_v34  ;;  %vm94_vm1 = vweird.f32 %v200_v36  ;;  %vm85_vm6 = vmor %vm83_vm5, %vm84_vm3 }
  0xd3   :  { %v79_v39 = vmul.f32 %v198_v35, %v78_v37  ;;  %vm95_vm4 = vmor %vm93_vm2, %vm94_vm1 }
  0xd4   :  { %v89_v40 = vmul.f32 %v200_v36, %v88_v38 }
  0xd5   :  { %v80_v41 = vmul.f32 0.5, %v79_v39 }
  0xd6   :  { %v90_v43 = vmul.f32 0.5, %v89_v40 }
  0xd7   :  { %v81_v45 = vsub.f32 1.5, %v80_v41 }
  0xd8   :  { %v91_v46 = vsub.f32 1.5, %v90_v43 }
  0xd9   :  { %v82_v50 = vmul.f32 %v198_v35, %v81_v45 }
  0xda   :  { %v92_v49 = vmul.f32 %v200_v36, %v91_v46 }
  0xdb   :  { %v86_v58 = vsel %vm85_vm6, %v198_v35, %v82_v50 }
  0xdc   :  { %v96_v53 = vsel %vm95_vm4, %v200_v36, %v92_v49  ;;  %v97_v63 = vmul.f32 %v86_v58, %v58_v57 }
  0xdd   :  { %v98_v54 = vmul.f32 %v96_v53, %v59_v48 }
  0xde   :  { %v103_v1 = vmul.f32 %v101_v0, %v97_v63  ;;  %v99_v3 = vmul.f32 %v97_v63, %v54_v25 }
  0xdf   :  { %v100_v60 = vmul.f32 %v98_v54, %v55_v26  ;;  %v104_v61 = vmul.f32 %v102_v55, %v98_v54 }
  0xe0   :  { %v105_v4 = vadd.f32 %v103_v1, %v60_v2 }
  0xe1   :  { %114 = vperm.xlu1 %193, %v100_v60   ;;  %v106_v62 = vadd.f32 %v104_v61, %v61_v56 }
  0xe3   :  { %129 = vperm.xlu2 %194, %v106_v62  }
  0xe9   :  { %109 = vperm.xlu1 %193, %v99_v3  }
  0xeb   :  { %124 = vperm.xlu2 %194, %v105_v4  }
  0xee   :  { %v165_v18 = vpop.permute.xlu0 %164 }
  0xef   :  { %v167_v19 = vperm.slane %v165_v18, 0 }
 0x13d   :  { %v130_v7 = vpop.permute.xlu2 %129 }
 0x145   :  { %v125_v14 = vpop.permute.xlu2 %124 }
 0x153   :  { %v115_v8 = vpop.permute.xlu1 %114 }
 0x154   :  { %v121_v9 = vmul.f32 %v196_v6, %v115_v8 }
 0x156   :  { %v133_v10 = vadd.f32 %v130_v7, %v121_v9 }
 0x158   :  { %v135_v11 = vmax.f32 %v133_v10, 0.0 }
 0x15a   :  { %155 = vmatpush.msra.mxu0 %v135_v11 }
 0x15b   :  { %v110_v12 = vpop.permute.xlu1 %109 }
 0x15c   :  { %v120_v13 = vmul.f32 %v196_v6, %v110_v12 }
 0x15e   :  { %v132_v15 = vadd.f32 %v125_v14, %v120_v13 }
 0x160   :  { %v134_v16 = vmax.f32 %v132_v15, 0.0 }
 0x162   :  { %156 = vmatpush.msra.mxu0 %v134_v16 }
 0x163   :  { %186 = vmatmul.msk.f32.vlgmr.msra.gmra.mxu0 %vm137_vm7, %v136_v17 }
 0x1e0   :  { %v158_v20 = vpop.f32.mrf.mxu0 }
 0x1e1   :  { %v168_v21 = vadd.f32 %v167_v19, %v158_v20 }
 0x1e3   :  { %169 = vst.msk [vmem:[#allocation3] sm:$0x1] %vm30_vm0, %v168_v21 }
 0x1e4   :  { %180 = dma.vmem_to_hbm [thread:$0]  %s176_s22, 16, %s178_s25, [#allocation4]  }
 0x1e5   :  { %225 = dma.done.wait [#allocation4], 16  }
 0x1e6   :  { %226 = vsyncadd [#allocation4], 4294967280 }
 0x1e7   :  { %185 = vsyncpa [#allocation4], 1 }

</bundles_post_ra>
